<compile_context>
chip_gen: v7x
topology: tpu7x:2x2x1
jax: 0.10.0
libtpu: 0.0.40
codegen_flags: <defaults>
</compile_context>

<pallas_src>
import functools
import math

import jax
import jax.numpy as jnp
from jax.experimental import pallas as pl
from jax.experimental.pallas import tpu as pltpu

_LANE = 128
_SUB = 8
_OUT_LANES = 128                  # per-(split, sample) stats packed into one vreg row
_MAX_COLS = 2048                  # lane-axis width of a block
_PAD_LOGIT = -30000.0             # exact-zero contribution pad: sigmoid->0, BCE(x,0)->0
                                  # (finite in f16/bf16/f32, so no inf*0 NaN)
_VMEM_MARGIN = 2 << 20            # headroom for Mosaic internal scratch


# ----------------------------------------------------------------------------
# Hardware-aware sizing
# ----------------------------------------------------------------------------
def _hw_budget():
    """(vmem_budget_bytes, target_block_elems).  Conservative v7x defaults."""
    budget, target = 48 << 20, 512 * 1024          # 2 MiB f32 blocks, 48 MiB VMEM
    try:
        cap = int(pltpu.get_tpu_info().vmem_capacity_bytes)
        if cap >= (100 << 20):                      # v5e / v6e: 128 MiB VMEM
            budget, target = 96 << 20, 1024 * 1024  # 4 MiB f32 blocks
        else:                                       # v7x: 64 MiB physical
            budget = min(budget, max(cap - (8 << 20), 32 << 20))
    except Exception:                               # interpret mode / older jax
        pass
    return budget, target


def _round_up(x, m):
    return ((x + m - 1) // m) * m


def _free_cols(hw):
    """Largest multiple-of-128 divisor of hw capped at _MAX_COLS, or None."""
    c = min(_MAX_COLS, (hw // _LANE) * _LANE)
    while c >= _LANE:
        if hw % c == 0:
            return c
        c -= _LANE
    return None


def _row_block(rows, cols, max_elems):
    """Row block: divides rows, multiple of 8 (or full rows if it fits); else None."""
    max_rows = max(1, max_elems // cols)
    if rows <= max_rows:
        return rows                               # full extent (always legal)
    d = (max_rows // _SUB) * _SUB
    while d >= _SUB:
        if rows % d == 0:
            return d
        d -= _SUB
    return None


def _plan_geometry(hw, bytes_per_elem, budget_bytes, target_elems):
    """Pick (cols, rows, r_blk, padded_hw); cols is always lane-dense (%128==0)."""
    usable = max(budget_bytes - _VMEM_MARGIN, 4 << 20)
    # Double-buffered input blocks dominate VMEM: 2 * block_elems * bytes_per_elem.
    max_elems = max(_SUB * _LANE, min(int(target_elems), usable // (2 * bytes_per_elem)))

    cols = _free_cols(hw)
    if cols is not None:                          # free-reshape path (no padding)
        rows = hw // cols
        r_blk = _row_block(rows, cols, max_elems)
        if r_blk is not None:
            return cols, rows, r_blk, hw

    # Padded path (ragged H*W): pad once in the wrapper with exact-zero-
    # contribution values so every statistic stays exact.
    # TODO(synk): an in-kernel tail mask (broadcasted_iota vs hw) would avoid the
    # one extra XLA pad pass on ragged inputs.
    cols = min(_MAX_COLS, _round_up(hw, _LANE))
    raw_rows = (hw + cols - 1) // cols
    max_rows = max(1, max_elems // cols)
    if raw_rows <= max_rows:
        r_blk = raw_rows
        rows = raw_rows
    else:
        r_blk = max(_SUB, (max_rows // _SUB) * _SUB)
        rows = _round_up(raw_rows, r_blk)
    return cols, rows, r_blk, rows * cols


# ----------------------------------------------------------------------------
# Kernel
# ----------------------------------------------------------------------------
def _fold_tile(x, fold_r, fold_c):
    """Fold an (r, c) f32 tile into (fold_r, fold_c) with aligned VPU adds.

    Keeps the per-step hot loop at ~1 VPU add per element per statistic; the
    single XLU cross-lane reduce happens once per (split, sample) in the
    epilogue.  Slices are x128 / x8 aligned so no relayout is generated.
    """
    r, c = x.shape
    if c != fold_c:
        acc = x[:, 0:fold_c]
        for ci in range(fold_c, c, fold_c):
            acc = acc + x[:, ci:ci + fold_c]
        x = acc
    if r != fold_r:
        acc = x[0:fold_r, :]
        for ri in range(fold_r, r, fold_r):
            acc = acc + x[ri:ri + fold_r, :]
        x = acc
    return x


def _stats_kernel(n_heads, is_refuge, fold_r, fold_c, *refs):
    """Accumulate per-(split, sample) reductions over the spatial grid axis.

    grid = (splits, N, n_j): axes 0/1 parallel (megacore), axis 2 arbitrary
    (spatial reduction).  VMEM accumulators are zeroed at j == 0 and reduced +
    written to the lane-packed output row at j == last.

      refuge: stats = [bce_sum_h]                 (1 per head)
      dice:   stats = [inter_h..., sp_h..., sy]   (2 per head + shared label sum)
    """
    pred_refs = refs[:n_heads]
    label_ref = refs[n_heads]
    out_ref = refs[n_heads + 1]
    acc_refs = refs[n_heads + 2:]

    j = pl.program_id(2)

    @pl.when(j == 0)
    def _init():
        for a in acc_refs:
            a[...] = jnp.zeros_like(a)

    y = label_ref[...].astype(jnp.float32)          # (r_blk, cols), native dtype in HBM

    if is_refuge:
        for h in range(n_heads):
            x = pred_refs[h][...].astype(jnp.float32)
            # Numerically stable BCE-with-logits (matches F.binary_cross_entropy_with_logits).
            bce = jnp.maximum(x, 0.0) - x * y + jnp.log1p(jnp.exp(-jnp.abs(x)))
            acc_refs[h][...] += _fold_tile(bce, fold_r, fold_c)
    else:
        for h in range(n_heads):
            x = pred_refs[h][...].astype(jnp.float32)
            p = jax.nn.sigmoid(x)
            acc_refs[h][...] += _fold_tile(p * y, fold_r, fold_c)           # intersection
            acc_refs[n_heads + h][...] += _fold_tile(p, fold_r, fold_c)     # sum sigmoid
        acc_refs[2 * n_heads][...] += _fold_tile(y, fold_r, fold_c)         # sum label (shared)

    @pl.when(j == pl.num_programs(2) - 1)
    def _finalize():
        lane = jax.lax.broadcasted_iota(jnp.int32, (1, _OUT_LANES), 1)
        row = jnp.zeros((1, _OUT_LANES), jnp.float32)
        for k, a in enumerate(acc_refs):
            tot = jnp.sum(a[...], axis=1, keepdims=True)   # (fold_r, 1)
            tot = jnp.sum(tot, axis=0, keepdims=True)      # (1, 1)
            row = jnp.where(lane == k, jnp.broadcast_to(tot, (1, _OUT_LANES)), row)
        out_ref[...] = row


def _per_sample_stats(preds, label, is_refuge, r_blk, n_splits, vmem_budget):
    """preds: tuple of (N, rows, cols) logits; label: (N, rows, cols) any dtype.

    Returns an (N, 128) f32 array whose first lanes hold the per-sample sums
    (split partials are summed here — linear, so safe before the nonlinear
    dice / mean combination done by the caller).
    """
    n_heads = len(preds)
    n, rows, cols = preds[0].shape
    n_j = (rows // r_blk) // n_splits
    fold_r = _SUB if (r_blk % _SUB == 0) else r_blk
    fold_c = _LANE if (cols % _LANE == 0) else cols
    n_stats = n_heads if is_refuge else (2 * n_heads + 1)

    in_specs = [
        pl.BlockSpec((None, r_blk, cols),
                     lambda s, i, j, _nj=n_j: (i, s * _nj + j, 0))
        for _ in range(n_heads + 1)
    ]
    # Per-(split, sample) output row, lane-dense; leading dims squeezed so the
    # block's last two dims are always legal ((1, 128) == full dims of (1, 128)).
    out_spec = pl.BlockSpec((None, None, 1, _OUT_LANES), lambda s, i, j: (s, i, 0, 0))
    scratch = [pltpu.VMEM((fold_r, fold_c), jnp.float32) for _ in range(n_stats)]

    # Exact VMEM need: double-buffered input blocks + output buffers + scratch + margin.
    in_block_bytes = int(sum(r_blk * cols * a.dtype.itemsize for a in (*preds, label)))
    need = (2 * in_block_bytes
            + 2 * _OUT_LANES * 4
            + n_stats * fold_r * fold_c * 4
            + _VMEM_MARGIN)
    vmem_limit = int(min(max(need, 16 << 20), vmem_budget))

    total_elems = n * rows * cols
    trans_per_elem = 2 if is_refuge else 1
    cost = pl.CostEstimate(
        flops=int((5 * n_heads + 1) * total_elems),
        transcendentals=int(trans_per_elem * n_heads * total_elems),
        bytes_accessed=int(sum(a.size * a.dtype.itemsize for a in (*preds, label))
                           + n_splits * n * _OUT_LANES * 4),
    )

    kernel = functools.partial(_stats_kernel, n_heads, is_refuge, fold_r, fold_c)
    out = pl.pallas_call(
        kernel,
        grid=(n_splits, n, n_j),
        in_specs=in_specs,
        out_specs=out_spec,
        out_shape=jax.ShapeDtypeStruct((n_splits, n, 1, _OUT_LANES), jnp.float32),
        scratch_shapes=scratch,
        compiler_params=pltpu.CompilerParams(
            dimension_semantics=("parallel", "parallel", "arbitrary"),
            vmem_limit_bytes=vmem_limit),
        cost_estimate=cost,
    )(*preds, label)
    # Combine the per-core/per-split LINEAR partial sums before any nonlinearity.
    return jnp.sum(out[:, :, 0, :], axis=0)               # (N, 128)


# ----------------------------------------------------------------------------
# Public wrapper (forward pass of GenAuxLoss)
# ----------------------------------------------------------------------------
def gen_aux_loss(outputs_dict, loss_weight=1.0, block_elems=None):
    """JAX/Pallas equivalent of GenAuxLoss.forward(outputs_dict).

    Labels may be handed in int8 / bf16 / f32 — they are consumed in their
    native dtype (cast happens in-kernel), so producers should prefer int8 to
    cut HBM traffic for this bandwidth-bound reduction.
    """
    pred = outputs_dict['aux_pred']                             # (N, 1, H, W) logits
    label = jnp.squeeze(outputs_dict['aux_label'], axis=1)      # (N, H, W)
    source = outputs_dict['source']                             # python str (static)
    is_refuge = (source == 'refuge')
    with_aux = bool(outputs_dict['with_auxiliary_head'])

    n = pred.shape[0]
    hw = int(math.prod(pred.shape[1:]))                         # 1*H*W
    preds = [pred]
    if with_aux:
        preds.append(outputs_dict['aux_source_seg'])
    n_heads = len(preds)

    vmem_budget, target = _hw_budget()
    if block_elems is not None:
        target = int(block_elems)
    bytes_per_elem = sum(p.dtype.itemsize for p in preds) + label.dtype.itemsize
    cols, rows, r_blk, padded_hw = _plan_geometry(hw, bytes_per_elem, vmem_budget, target)

    def to3(x, pad_value):
        x2 = x.reshape(n, hw)
        if padded_hw != hw:
            x2 = jnp.pad(x2, ((0, 0), (0, padded_hw - hw)), constant_values=pad_value)
        return x2.reshape(n, rows, cols)

    # Free reshapes in the common case; the ragged case pads once (exact-zero
    # contribution) to keep the kernel lane/sublane dense.
    preds3 = tuple(to3(p, _PAD_LOGIT) for p in preds)
    label3 = to3(label, 0)

    n_j_total = rows // r_blk
    # Core-split of the spatial reduction (v7x megacore even for N==1 / odd N);
    # a no-op cost on single-TC v5e/v6e.
    n_splits = 2 if (n_j_total >= 2 and n_j_total % 2 == 0) else 1

    stats = _per_sample_stats(preds3, label3, is_refuge, r_blk, n_splits, vmem_budget)

    head_w = (1.0, 0.1)
    loss = jnp.float32(0.0)
    if is_refuge:
        # CrossEntropyLoss(use_sigmoid=True): mean BCE-with-logits over all TRUE elements.
        inv_total = 1.0 / float(n * hw)
        for h in range(n_heads):
            loss = loss + head_w[h] * loss_weight * jnp.sum(stats[:, h]) * inv_total
    else:
        # BinaryLoss(loss_type='dice', smooth=1e-5): dice per sample, mean over batch.
        smooth = jnp.float32(1e-5)
        sy = stats[:, 2 * n_heads]
        for h in range(n_heads):
            inter = stats[:, h]
            sp = stats[:, n_heads + h]
            dice = (2.0 * inter + smooth) / (sp + sy + smooth)
            loss = loss + head_w[h] * loss_weight * jnp.mean(1.0 - dice)
    return loss


# ----------------------------------------------------------------------------
# Pure-JAX reference (mirrors the PyTorch semantics) for validation
# ----------------------------------------------------------------------------
def _reference_loss(outputs_dict, loss_weight=1.0):
    pred = outputs_dict['aux_pred']
    label = jnp.squeeze(outputs_dict['aux_label'], axis=1)
    source = outputs_dict['source']

    def single(p):
        x = p.reshape(p.shape[0], -1).astype(jnp.float32)
        y = label.reshape(label.shape[0], -1).astype(jnp.float32)
        if source == 'refuge':
            bce = jnp.maximum(x, 0.0) - x * y + jnp.log1p(jnp.exp(-jnp.abs(x)))
            return loss_weight * jnp.mean(bce)
        smooth = 1e-5
        pr = jax.nn.sigmoid(x)
        inter = jnp.sum(pr * y, axis=1)
        sp = jnp.sum(pr, axis=1)
        sy = jnp.sum(y, axis=1)
        dice = (2.0 * inter + smooth) / (sp + sy + smooth)
        return loss_weight * jnp.mean(1.0 - dice)

    loss = single(pred)
    if outputs_dict['with_auxiliary_head']:
        loss = loss + 0.1 * single(outputs_dict['aux_source_seg'])
    return loss


if __name__ == "__main__":
    root = jax.random.PRNGKey(0)

    def make_outputs(key, n, h, w, label_dtype=jnp.float32):
        k1, k2, k3 = jax.random.split(key, 3)
        pred = jax.random.normal(k1, (n, 1, h, w), dtype=jnp.float32)
        aux = jax.random.normal(k2, (n, 1, h, w), dtype=jnp.float32)
        lbl = (jax.random.uniform(k3, (n, 1, h, w)) > 0.5).astype(label_dtype)
        return pred, aux, lbl

    k1, k2, k3, k4 = jax.random.split(root, 4)
    checks = []

    # --- Small shape (N=2, 16x16), f32 labels --------------------------------
    pred, aux, lbl = make_outputs(k1, 2, 16, 16)
    out_dice = {'aux_pred': pred, 'aux_label': lbl, 'aux_source_seg': aux,
                'source': 'other_dataset', 'with_auxiliary_head': True}
    got = jax.block_until_ready(gen_aux_loss(out_dice, loss_weight=1.0))
    want = jax.block_until_ready(_reference_loss(out_dice, loss_weight=1.0))
    checks.append(('dice+aux 16x16 f32lbl', got, want))

    # --- Small shape, refuge branch, int8 labels (reduced label HBM traffic) -
    pred, aux, lbl8 = make_outputs(k1, 2, 16, 16, label_dtype=jnp.int8)
    out_ce = {'aux_pred': pred, 'aux_label': lbl8, 'aux_source_seg': aux,
              'source': 'refuge', 'with_auxiliary_head': False}
    got = jax.block_until_ready(gen_aux_loss(out_ce, loss_weight=1.0))
    want = jax.block_until_ready(_reference_loss(out_ce, loss_weight=1.0))
    checks.append(('refuge 16x16 int8lbl', got, want))

    # --- 256x256, default (large) blocks, int8 labels, dice + aux ------------
    pred2, aux2, lbl2_8 = make_outputs(k2, 2, 256, 256, label_dtype=jnp.int8)
    out_dice2 = {'aux_pred': pred2, 'aux_label': lbl2_8, 'aux_source_seg': aux2,
                 'source': 'other_dataset', 'with_auxiliary_head': True}
    got = jax.block_until_ready(gen_aux_loss(out_dice2, loss_weight=0.5))
    want = jax.block_until_ready(_reference_loss(out_dice2, loss_weight=0.5))
    checks.append(('dice+aux 256x256 int8lbl', got, want))

    # --- 256x256 with a forced-small block budget: exercises the multi-step
    #     accumulating grid AND the spatial core-split (splits=2) path --------
    pred3, aux3, lbl3 = make_outputs(k3, 2, 256, 256)
    small_blocks = _SUB * _MAX_COLS   # 8 rows x 2048 cols per step -> n_j_total=4
    out_dice3 = {'aux_pred': pred3, 'aux_label': lbl3, 'aux_source_seg': aux3,
                 'source': 'other_dataset', 'with_auxiliary_head': True}
    got = jax.block_until_ready(gen_aux_loss(out_dice3, loss_weight=1.0,
                                             block_elems=small_blocks))
    want = jax.block_until_ready(_reference_loss(out_dice3, loss_weight=1.0))
    checks.append(('dice+aux 256x256 tiled+split', got, want))

    out_ce3 = {'aux_pred': pred3, 'aux_label': lbl3, 'aux_source_seg': aux3,
               'source': 'refuge', 'with_auxiliary_head': True}
    got = jax.block_until_ready(gen_aux_loss(out_ce3, loss_weight=1.0,
                                             block_elems=small_blocks))
    want = jax.block_until_ready(_reference_loss(out_ce3, loss_weight=1.0))
    checks.append(('refuge+aux 256x256 tiled+split', got, want))

    # --- Ragged H*W (20x20 = 400, no multiple-of-128 divisor): padded path ---
    pred4, aux4, lbl4 = make_outputs(k4, 2, 20, 20)
    out_rag = {'aux_pred': pred4, 'aux_label': lbl4, 'aux_source_seg': aux4,
               'source': 'other_dataset', 'with_auxiliary_head': True}
    got = jax.block_until_ready(gen_aux_loss(out_rag, loss_weight=1.0))
    want = jax.block_until_ready(_reference_loss(out_rag, loss_weight=1.0))
    checks.append(('dice+aux 20x20 ragged', got, want))

    for name, got, want in checks:
        g, w = float(got), float(want)
        assert math.isfinite(g), (name, g)
        assert abs(g - w) <= 1e-4 + 1e-4 * abs(w), (name, g, w)

    print("KERNEL_OK")
</pallas_src>

<mosaic_0001>
module attributes {stable_mosaic.version = 11 : i64} {
  func.func @_stats_kernel(%arg0: i32, %arg1: i32, %arg2: i32, %arg3: memref<1x1x256xf32, #tpu.memory_space<vmem>>, %arg4: memref<1x1x256xf32, #tpu.memory_space<vmem>>, %arg5: memref<1x1x256xf32, #tpu.memory_space<vmem>>, %arg6: memref<1x1x1x128xf32, #tpu.memory_space<vmem>>, %arg7: memref<1x128xf32, #tpu.memory_space<vmem>>, %arg8: memref<1x128xf32, #tpu.memory_space<vmem>>, %arg9: memref<1x128xf32, #tpu.memory_space<vmem>>, %arg10: memref<1x128xf32, #tpu.memory_space<vmem>>, %arg11: memref<1x128xf32, #tpu.memory_space<vmem>>) attributes {dimension_semantics = [#tpu.dimension_semantics<parallel>, #tpu.dimension_semantics<parallel>, #tpu.dimension_semantics<arbitrary>], iteration_bounds = array<i64: 1, 2, 1>, scalar_prefetch = 0 : i64, scratch_operands = 5 : i64, tpu.core_type = #tpu.core_type<tc>, window_params = [{transform_indices = @transform_0, window_bounds = array<i64: 1, 1, 256>}, {transform_indices = @transform_1, window_bounds = array<i64: 1, 1, 256>}, {transform_indices = @transform_2, window_bounds = array<i64: 1, 1, 256>}, {transform_indices = @transform_3, window_bounds = array<i64: 1, 1, 1, 128>}]} {
    %c0_i32 = arith.constant 0 : i32
    %0 = arith.cmpi eq, %arg2, %c0_i32 : i32
    %1 = arith.extui %0 : i1 to i32
    %c0_i32_0 = arith.constant 0 : i32
    %2 = arith.cmpi ne, %1, %c0_i32_0 : i32
    scf.if %2 {
      %cst_32 = arith.constant 0.000000e+00 : f32
      %54 = vector.broadcast %cst_32 : f32 to vector<1x128xf32>
      %c0_33 = arith.constant 0 : index
      %c0_34 = arith.constant 0 : index
      %55 = vector.load %arg7[%c0_33, %c0_34] : memref<1x128xf32, #tpu.memory_space<vmem>>, vector<1x128xf32>
      tpu.vector_store %arg7[%c0_33, %c0_34], %54 {strides = array<i32>} : memref<1x128xf32, #tpu.memory_space<vmem>>, vector<1x128xf32>,
      %cst_35 = arith.constant 0.000000e+00 : f32
      %56 = vector.broadcast %cst_35 : f32 to vector<1x128xf32>
      %c0_36 = arith.constant 0 : index
      %c0_37 = arith.constant 0 : index
      %57 = vector.load %arg8[%c0_36, %c0_37] : memref<1x128xf32, #tpu.memory_space<vmem>>, vector<1x128xf32>
      tpu.vector_store %arg8[%c0_36, %c0_37], %56 {strides = array<i32>} : memref<1x128xf32, #tpu.memory_space<vmem>>, vector<1x128xf32>,
      %cst_38 = arith.constant 0.000000e+00 : f32
      %58 = vector.broadcast %cst_38 : f32 to vector<1x128xf32>
      %c0_39 = arith.constant 0 : index
      %c0_40 = arith.constant 0 : index
      %59 = vector.load %arg9[%c0_39, %c0_40] : memref<1x128xf32, #tpu.memory_space<vmem>>, vector<1x128xf32>
      tpu.vector_store %arg9[%c0_39, %c0_40], %58 {strides = array<i32>} : memref<1x128xf32, #tpu.memory_space<vmem>>, vector<1x128xf32>,
      %cst_41 = arith.constant 0.000000e+00 : f32
      %60 = vector.broadcast %cst_41 : f32 to vector<1x128xf32>
      %c0_42 = arith.constant 0 : index
      %c0_43 = arith.constant 0 : index
      %61 = vector.load %arg10[%c0_42, %c0_43] : memref<1x128xf32, #tpu.memory_space<vmem>>, vector<1x128xf32>
      tpu.vector_store %arg10[%c0_42, %c0_43], %60 {strides = array<i32>} : memref<1x128xf32, #tpu.memory_space<vmem>>, vector<1x128xf32>,
      %cst_44 = arith.constant 0.000000e+00 : f32
      %62 = vector.broadcast %cst_44 : f32 to vector<1x128xf32>
      %c0_45 = arith.constant 0 : index
      %c0_46 = arith.constant 0 : index
      %63 = vector.load %arg11[%c0_45, %c0_46] : memref<1x128xf32, #tpu.memory_space<vmem>>, vector<1x128xf32>
      tpu.vector_store %arg11[%c0_45, %c0_46], %62 {strides = array<i32>} : memref<1x128xf32, #tpu.memory_space<vmem>>, vector<1x128xf32>,
    } else {
    }
    %c0 = arith.constant 0 : index
    %c0_1 = arith.constant 0 : index
    %c0_2 = arith.constant 0 : index
    %3 = vector.load %arg5[%c0, %c0_1, %c0_2] : memref<1x1x256xf32, #tpu.memory_space<vmem>>, vector<1x1x256xf32>
    %4 = vector.shape_cast %3 : vector<1x1x256xf32> to vector<1x256xf32>
    %c0_3 = arith.constant 0 : index
    %c0_4 = arith.constant 0 : index
    %c0_5 = arith.constant 0 : index
    %5 = vector.load %arg3[%c0_3, %c0_4, %c0_5] : memref<1x1x256xf32, #tpu.memory_space<vmem>>, vector<1x1x256xf32>
    %6 = vector.shape_cast %5 : vector<1x1x256xf32> to vector<1x256xf32>
    %7 = arith.negf %6 : vector<1x256xf32>
    %8 = math.exp %7 : vector<1x256xf32>
    %cst = arith.constant 1.000000e+00 : f32
    %9 = vector.broadcast %cst : f32 to vector<1x256xf32>
    %10 = arith.addf %9, %8 : vector<1x256xf32>
    %11 = arith.divf %9, %10 : vector<1x256xf32>
    %c0_6 = arith.constant 0 : index
    %c0_7 = arith.constant 0 : index
    %12 = vector.load %arg7[%c0_6, %c0_7] : memref<1x128xf32, #tpu.memory_space<vmem>>, vector<1x128xf32>
    %13 = arith.mulf %11, %4 : vector<1x256xf32>
    %14 = vector.extract_strided_slice %13 {offsets = [0, 0], sizes = [1, 128], strides = [1, 1]} : vector<1x256xf32> to vector<1x128xf32>
    %15 = vector.extract_strided_slice %13 {offsets = [0, 128], sizes = [1, 128], strides = [1, 1]} : vector<1x256xf32> to vector<1x128xf32>
    %16 = arith.addf %14, %15 : vector<1x128xf32>
    %17 = arith.addf %12, %16 : vector<1x128xf32>
    %c0_8 = arith.constant 0 : index
    %c0_9 = arith.constant 0 : index
    %18 = vector.load %arg7[%c0_8, %c0_9] : memref<1x128xf32, #tpu.memory_space<vmem>>, vector<1x128xf32>
    tpu.vector_store %arg7[%c0_8, %c0_9], %17 {strides = array<i32>} : memref<1x128xf32, #tpu.memory_space<vmem>>, vector<1x128xf32>,
    %c0_10 = arith.constant 0 : index
    %c0_11 = arith.constant 0 : index
    %19 = vector.load %arg9[%c0_10, %c0_11] : memref<1x128xf32, #tpu.memory_space<vmem>>, vector<1x128xf32>
    %20 = vector.extract_strided_slice %11 {offsets = [0, 0], sizes = [1, 128], strides = [1, 1]} : vector<1x256xf32> to vector<1x128xf32>
    %21 = vector.extract_strided_slice %11 {offsets = [0, 128], sizes = [1, 128], strides = [1, 1]} : vector<1x256xf32> to vector<1x128xf32>
    %22 = arith.addf %20, %21 : vector<1x128xf32>
    %23 = arith.addf %19, %22 : vector<1x128xf32>
    %c0_12 = arith.constant 0 : index
    %c0_13 = arith.constant 0 : index
    %24 = vector.load %arg9[%c0_12, %c0_13] : memref<1x128xf32, #tpu.memory_space<vmem>>, vector<1x128xf32>
    tpu.vector_store %arg9[%c0_12, %c0_13], %23 {strides = array<i32>} : memref<1x128xf32, #tpu.memory_space<vmem>>, vector<1x128xf32>,
    %c0_14 = arith.constant 0 : index
    %c0_15 = arith.constant 0 : index
    %c0_16 = arith.constant 0 : index
    %25 = vector.load %arg4[%c0_14, %c0_15, %c0_16] : memref<1x1x256xf32, #tpu.memory_space<vmem>>, vector<1x1x256xf32>
    %26 = vector.shape_cast %25 : vector<1x1x256xf32> to vector<1x256xf32>
    %27 = arith.negf %26 : vector<1x256xf32>
    %28 = math.exp %27 : vector<1x256xf32>
    %cst_17 = arith.constant 1.000000e+00 : f32
    %29 = vector.broadcast %cst_17 : f32 to vector<1x256xf32>
    %30 = arith.addf %29, %28 : vector<1x256xf32>
    %31 = arith.divf %29, %30 : vector<1x256xf32>
    %c0_18 = arith.constant 0 : index
    %c0_19 = arith.constant 0 : index
    %32 = vector.load %arg8[%c0_18, %c0_19] : memref<1x128xf32, #tpu.memory_space<vmem>>, vector<1x128xf32>
    %33 = arith.mulf %31, %4 : vector<1x256xf32>
    %34 = vector.extract_strided_slice %33 {offsets = [0, 0], sizes = [1, 128], strides = [1, 1]} : vector<1x256xf32> to vector<1x128xf32>
    %35 = vector.extract_strided_slice %33 {offsets = [0, 128], sizes = [1, 128], strides = [1, 1]} : vector<1x256xf32> to vector<1x128xf32>
    %36 = arith.addf %34, %35 : vector<1x128xf32>
    %37 = arith.addf %32, %36 : vector<1x128xf32>
    %c0_20 = arith.constant 0 : index
    %c0_21 = arith.constant 0 : index
    %38 = vector.load %arg8[%c0_20, %c0_21] : memref<1x128xf32, #tpu.memory_space<vmem>>, vector<1x128xf32>
    tpu.vector_store %arg8[%c0_20, %c0_21], %37 {strides = array<i32>} : memref<1x128xf32, #tpu.memory_space<vmem>>, vector<1x128xf32>,
    %c0_22 = arith.constant 0 : index
    %c0_23 = arith.constant 0 : index
    %39 = vector.load %arg10[%c0_22, %c0_23] : memref<1x128xf32, #tpu.memory_space<vmem>>, vector<1x128xf32>
    %40 = vector.extract_strided_slice %31 {offsets = [0, 0], sizes = [1, 128], strides = [1, 1]} : vector<1x256xf32> to vector<1x128xf32>
    %41 = vector.extract_strided_slice %31 {offsets = [0, 128], sizes = [1, 128], strides = [1, 1]} : vector<1x256xf32> to vector<1x128xf32>
    %42 = arith.addf %40, %41 : vector<1x128xf32>
    %43 = arith.addf %39, %42 : vector<1x128xf32>
    %c0_24 = arith.constant 0 : index
    %c0_25 = arith.constant 0 : index
    %44 = vector.load %arg10[%c0_24, %c0_25] : memref<1x128xf32, #tpu.memory_space<vmem>>, vector<1x128xf32>
    tpu.vector_store %arg10[%c0_24, %c0_25], %43 {strides = array<i32>} : memref<1x128xf32, #tpu.memory_space<vmem>>, vector<1x128xf32>,
    %c0_26 = arith.constant 0 : index
    %c0_27 = arith.constant 0 : index
    %45 = vector.load %arg11[%c0_26, %c0_27] : memref<1x128xf32, #tpu.memory_space<vmem>>, vector<1x128xf32>
    %46 = vector.extract_strided_slice %4 {offsets = [0, 0], sizes = [1, 128], strides = [1, 1]} : vector<1x256xf32> to vector<1x128xf32>
    %47 = vector.extract_strided_slice %4 {offsets = [0, 128], sizes = [1, 128], strides = [1, 1]} : vector<1x256xf32> to vector<1x128xf32>
    %48 = arith.addf %46, %47 : vector<1x128xf32>
    %49 = arith.addf %45, %48 : vector<1x128xf32>
    %c0_28 = arith.constant 0 : index
    %c0_29 = arith.constant 0 : index
    %50 = vector.load %arg11[%c0_28, %c0_29] : memref<1x128xf32, #tpu.memory_space<vmem>>, vector<1x128xf32>
    tpu.vector_store %arg11[%c0_28, %c0_29], %49 {strides = array<i32>} : memref<1x128xf32, #tpu.memory_space<vmem>>, vector<1x128xf32>,
    %c0_i32_30 = arith.constant 0 : i32
    %51 = arith.cmpi eq, %arg2, %c0_i32_30 : i32
    %52 = arith.extui %51 : i1 to i32
    %c0_i32_31 = arith.constant 0 : i32
    %53 = arith.cmpi ne, %52, %c0_i32_31 : i32
    scf.if %53 {
      %54 = tpu.iota {dimensions = array<i32: 1>} : vector<1x128xi32>
      %cst_32 = arith.constant 0.000000e+00 : f32
      %55 = vector.broadcast %cst_32 : f32 to vector<1x128xf32>
      %c0_33 = arith.constant 0 : index
      %c0_34 = arith.constant 0 : index
      %56 = vector.load %arg7[%c0_33, %c0_34] : memref<1x128xf32, #tpu.memory_space<vmem>>, vector<1x128xf32>
      %cst_35 = arith.constant dense<0.000000e+00> : vector<1xf32>
      %57 = vector.multi_reduction <add>, %56, %cst_35 [1] : vector<1x128xf32> to vector<1xf32>
      %58 = vector.shape_cast %57 : vector<1xf32> to vector<1x1xf32>
      %cst_36 = arith.constant dense<0.000000e+00> : vector<1xf32>
      %59 = vector.multi_reduction <add>, %58, %cst_36 [0] : vector<1x1xf32> to vector<1xf32>
      %60 = vector.shape_cast %59 : vector<1xf32> to vector<1x1xf32>
      %c0_i32_37 = arith.constant 0 : i32
      %61 = vector.broadcast %c0_i32_37 : i32 to vector<1x128xi32>
      %62 = arith.cmpi eq, %54, %61 : vector<1x128xi32>
      %63 = vector.shape_cast %60 : vector<1x1xf32> to vector<1x1xf32>
      %64 = vector.broadcast %63 : vector<1x1xf32> to vector<1x128xf32>
      %65 = arith.select %62, %64, %55 : vector<1x128xi1>, vector<1x128xf32>
      %c0_38 = arith.constant 0 : index
      %c0_39 = arith.constant 0 : index
      %66 = vector.load %arg8[%c0_38, %c0_39] : memref<1x128xf32, #tpu.memory_space<vmem>>, vector<1x128xf32>
      %cst_40 = arith.constant dense<0.000000e+00> : vector<1xf32>
      %67 = vector.multi_reduction <add>, %66, %cst_40 [1] : vector<1x128xf32> to vector<1xf32>
      %68 = vector.shape_cast %67 : vector<1xf32> to vector<1x1xf32>
      %cst_41 = arith.constant dense<0.000000e+00> : vector<1xf32>
      %69 = vector.multi_reduction <add>, %68, %cst_41 [0] : vector<1x1xf32> to vector<1xf32>
      %70 = vector.shape_cast %69 : vector<1xf32> to vector<1x1xf32>
      %c1_i32 = arith.constant 1 : i32
      %71 = vector.broadcast %c1_i32 : i32 to vector<1x128xi32>
      %72 = arith.cmpi eq, %54, %71 : vector<1x128xi32>
      %73 = vector.shape_cast %70 : vector<1x1xf32> to vector<1x1xf32>
      %74 = vector.broadcast %73 : vector<1x1xf32> to vector<1x128xf32>
      %75 = arith.select %72, %74, %65 : vector<1x128xi1>, vector<1x128xf32>
      %c0_42 = arith.constant 0 : index
      %c0_43 = arith.constant 0 : index
      %76 = vector.load %arg9[%c0_42, %c0_43] : memref<1x128xf32, #tpu.memory_space<vmem>>, vector<1x128xf32>
      %cst_44 = arith.constant dense<0.000000e+00> : vector<1xf32>
      %77 = vector.multi_reduction <add>, %76, %cst_44 [1] : vector<1x128xf32> to vector<1xf32>
      %78 = vector.shape_cast %77 : vector<1xf32> to vector<1x1xf32>
      %cst_45 = arith.constant dense<0.000000e+00> : vector<1xf32>
      %79 = vector.multi_reduction <add>, %78, %cst_45 [0] : vector<1x1xf32> to vector<1xf32>
      %80 = vector.shape_cast %79 : vector<1xf32> to vector<1x1xf32>
      %c2_i32 = arith.constant 2 : i32
      %81 = vector.broadcast %c2_i32 : i32 to vector<1x128xi32>
      %82 = arith.cmpi eq, %54, %81 : vector<1x128xi32>
      %83 = vector.shape_cast %80 : vector<1x1xf32> to vector<1x1xf32>
      %84 = vector.broadcast %83 : vector<1x1xf32> to vector<1x128xf32>
      %85 = arith.select %82, %84, %75 : vector<1x128xi1>, vector<1x128xf32>
      %c0_46 = arith.constant 0 : index
      %c0_47 = arith.constant 0 : index
      %86 = vector.load %arg10[%c0_46, %c0_47] : memref<1x128xf32, #tpu.memory_space<vmem>>, vector<1x128xf32>
      %cst_48 = arith.constant dense<0.000000e+00> : vector<1xf32>
      %87 = vector.multi_reduction <add>, %86, %cst_48 [1] : vector<1x128xf32> to vector<1xf32>
      %88 = vector.shape_cast %87 : vector<1xf32> to vector<1x1xf32>
      %cst_49 = arith.constant dense<0.000000e+00> : vector<1xf32>
      %89 = vector.multi_reduction <add>, %88, %cst_49 [0] : vector<1x1xf32> to vector<1xf32>
      %90 = vector.shape_cast %89 : vector<1xf32> to vector<1x1xf32>
      %c3_i32 = arith.constant 3 : i32
      %91 = vector.broadcast %c3_i32 : i32 to vector<1x128xi32>
      %92 = arith.cmpi eq, %54, %91 : vector<1x128xi32>
      %93 = vector.shape_cast %90 : vector<1x1xf32> to vector<1x1xf32>
      %94 = vector.broadcast %93 : vector<1x1xf32> to vector<1x128xf32>
      %95 = arith.select %92, %94, %85 : vector<1x128xi1>, vector<1x128xf32>
      %c0_50 = arith.constant 0 : index
      %c0_51 = arith.constant 0 : index
      %96 = vector.load %arg11[%c0_50, %c0_51] : memref<1x128xf32, #tpu.memory_space<vmem>>, vector<1x128xf32>
      %cst_52 = arith.constant dense<0.000000e+00> : vector<1xf32>
      %97 = vector.multi_reduction <add>, %96, %cst_52 [1] : vector<1x128xf32> to vector<1xf32>
      %98 = vector.shape_cast %97 : vector<1xf32> to vector<1x1xf32>
      %cst_53 = arith.constant dense<0.000000e+00> : vector<1xf32>
      %99 = vector.multi_reduction <add>, %98, %cst_53 [0] : vector<1x1xf32> to vector<1xf32>
      %100 = vector.shape_cast %99 : vector<1xf32> to vector<1x1xf32>
      %c4_i32 = arith.constant 4 : i32
      %101 = vector.broadcast %c4_i32 : i32 to vector<1x128xi32>
      %102 = arith.cmpi eq, %54, %101 : vector<1x128xi32>
      %103 = vector.shape_cast %100 : vector<1x1xf32> to vector<1x1xf32>
      %104 = vector.broadcast %103 : vector<1x1xf32> to vector<1x128xf32>
      %105 = arith.select %102, %104, %95 : vector<1x128xi1>, vector<1x128xf32>
      %c0_54 = arith.constant 0 : index
      %c0_55 = arith.constant 0 : index
      %c0_56 = arith.constant 0 : index
      %c0_57 = arith.constant 0 : index
      %106 = vector.load %arg6[%c0_54, %c0_55, %c0_56, %c0_57] : memref<1x1x1x128xf32, #tpu.memory_space<vmem>>, vector<1x1x1x128xf32>
      %107 = vector.shape_cast %106 : vector<1x1x1x128xf32> to vector<1x128xf32>
      %108 = vector.shape_cast %105 : vector<1x128xf32> to vector<1x1x1x128xf32>
      tpu.vector_store %arg6[%c0_54, %c0_55, %c0_56, %c0_57], %108 {strides = array<i32>} : memref<1x1x1x128xf32, #tpu.memory_space<vmem>>, vector<1x1x1x128xf32>,
    } else {
    }
    return
  }
  func.func @transform_0(%arg0: i32, %arg1: i32, %arg2: i32) -> (i32, i32, i32) {
    %c1_i32 = arith.constant 1 : i32
    %0 = arith.muli %arg0, %c1_i32 : i32
    %1 = arith.addi %0, %arg2 : i32
    %c0_i32 = arith.constant 0 : i32
    %c0_i32_0 = arith.constant 0 : i32
    return %arg1, %1, %c0_i32 : i32, i32, i32
  }
  func.func @transform_1(%arg0: i32, %arg1: i32, %arg2: i32) -> (i32, i32, i32) {
    %c1_i32 = arith.constant 1 : i32
    %0 = arith.muli %arg0, %c1_i32 : i32
    %1 = arith.addi %0, %arg2 : i32
    %c0_i32 = arith.constant 0 : i32
    %c0_i32_0 = arith.constant 0 : i32
    return %arg1, %1, %c0_i32 : i32, i32, i32
  }
  func.func @transform_2(%arg0: i32, %arg1: i32, %arg2: i32) -> (i32, i32, i32) {
    %c1_i32 = arith.constant 1 : i32
    %0 = arith.muli %arg0, %c1_i32 : i32
    %1 = arith.addi %0, %arg2 : i32
    %c0_i32 = arith.constant 0 : i32
    %c0_i32_0 = arith.constant 0 : i32
    return %arg1, %1, %c0_i32 : i32, i32, i32
  }
  func.func @transform_3(%arg0: i32, %arg1: i32, %arg2: i32) -> (i32, i32, i32, i32) {
    %c0_i32 = arith.constant 0 : i32
    %c0_i32_0 = arith.constant 0 : i32
    %c0_i32_1 = arith.constant 0 : i32
    return %arg0, %arg1, %c0_i32, %c0_i32_0 : i32, i32, i32, i32
  }
}

</mosaic_0001>

<bundles_post_ra>
// kernel: tpu_custom_call.1
= control target key start
LH: loop header
LB: loop body
LE: loop exit
PB: predicated region body
PF: predicated region fallthrough
CT: control target
= control target key end

     0   :  { %8 = vsyncpa [#allocation8], 0  ;;  %s1040_s0 = inlined_call_operand.hbm [shape: f32[2,1,256], index: 0, kind: input, shape index: {}]   ;;  %s1041_s1 = inlined_call_operand.hbm [shape: f32[2,1,256], index: 1, kind: input, shape index: {}]   ;;  %s1042_s2 = inlined_call_operand.vmem [shape: f32[2,1,256], index: 2, kind: input, shape index: {}]   ;;  %s1043_s3 = inlined_call_operand.hbm [shape: f32[1,2,1,128], index: 3, kind: output, shape index: {}]  }
   0x1   :  { %10 = vsyncpa [#allocation8 + $0x1], 0 }
   0x2   :  { %11 = vsyncpa [#allocation11], 0 }
   0x3   :  { %13 = vsyncpa [#allocation11 + $0x1], 0 }
   0x4   :  { %14 = vsyncpa [#allocation9], 0 }
   0x5   :  { %16 = vsyncpa [#allocation9 + $0x1], 0  ;;  %s814_s12 = smov 0   ;;  %s816_s13 = smov 0  }
   0x6   :  { %s818_s14 = smov 0   ;;  %s820_s15 = smov 0  }
   0x7   :  { %s822_s16 = smov 0   ;;  %s824_s17 = smov 0  }
   0x8 LB: > { %s545_s18 = sadd.s32 4294967295, %s788_s17   ;;  %s546_s19 = sadd.s32 4294967294, %s788_s17   ;;  %s788_s17 = sphi %s824_s17, %s22_s17   ;;  %s784_s16 = sphi %s822_s16, %s1063_s16   ;;  %s780_s15 = sphi %s820_s15, %s1062_s15   ;;  %s776_s14 = sphi %s818_s14, %s1061_s14   ;;  %s772_s13 = sphi %s816_s13, %s1060_s13   ;;  %s768_s12 = sphi %s814_s12, %s1059_s12  }
   0x9   : > { %s37_s20 = sadd.s32 1, %s784_s16  ;;  %s52_s21 = sadd.s32 1, %s776_s14 }
   0xa   : > { %p39_p0 = scmp.ge.s32.totalorder %s37_s20, 2  ;;  %p59_p1 = scmp.ne.s32.totalorder %s776_s14, %s772_s13 }
   0xb   : > { %p60_p2 = scmp.eq.s32.totalorder %s788_s17, 0  ;;  %p65_p3 = scmp.ne.s32.totalorder %s772_s13, %s768_s12 }
   0xc   : > { %s1065_s20 = smov (%p39_p0, %s37_s20), 0  ;;  %p66_p5 = scmp.eq.s32.totalorder %s545_s18, 0 }
   0xd   : > { %p855_p4 = por %p60_p2, %p59_p1  ;;  %s47_s23 = ssub.s32 %s784_s16, %s1065_s20 }
   0xe   : > { %p151_p6 = scmp.eq.s32.totalorder %s545_s18, 1  ;;  %p50_p7 = scmp.eq.s32.totalorder %s47_s23, 0 }
   0xf   : > { %p861_p8 = por %p66_p5, %p65_p3  ;;  %p157_p10 = scmp.eq.s32.totalorder %s546_s19, 1 }
  0x10   : > { %p865_p9 = por %p151_p6, %p59_p1  ;;  %p583_p13 = scmp.lt.s32.totalorder %s788_s17, 2 }
  0x11   : > { %s1047_s24 = scalar_select %p861_p8, 1, 0 }
  0x12   : > { %s1048_s25 = scalar_select %p865_p9, 1, 0 }
  0x13   : > { %s870_s26 = scalar_select %p50_p7, %s776_s14, %s52_s21  }
  0x14   : > { %p872_p11 = por %p157_p10, %p65_p3  ;;  %s879_s28 = sand.u32 1, %s776_s14  }
  0x15   : > { %s549_s29 = sshll.u32 %s879_s28, 1  ;;  %s564_s30 = sshll.u32 %s784_s16, 5 }
  0x16   : > { %s1049_s27 = scalar_select %p872_p11, 1, 0 }
  0x17   : > { %s888_s6 = scalar_lea.hbm %s1040_s0, %s564_s30  ;;  %s181_s7 = scalar_lea.vmem [#allocation7], %s549_s29 }
  0x18   : > { %s192_s8 = sshll.u32 %s181_s7, 4  ;;  %p896_p0 = pnand %p583_p13, %p855_p4  ;;  %s892_s8 = int_to_ptr.vmem [resolvable:$true] %s192_s8 }
  0x19   : > { %s178_s10 = scalar_lea.sflag [#allocation8], %s879_s28  ;;  %s642_s11 = scalar_lea.hbm %s888_s6, 32 }
  0x1a   : > { %p643_p3 = scmp.ne.s32.totalorder %s888_s6, %s642_s11  ;;  %p644_p5 = pneg %p896_p0 }
  0x1b   : > { %s647_s21 = scalar_lea.hbm %s1040_s0, 64  ;;  %p648_p4 = scmp.lt.u32.totalorder %s888_s6, %s1040_s0 }
  0x1c   : > { %p645_p6 = pnand %p644_p5, %p643_p3  ;;  %p649_p10 = scmp.lt.u32.totalorder %s647_s21, %s642_s11 }
  0x1d   : > { %p651_p12 = scmp.lt.u32.totalorder %s642_s11, %s888_s6 }
  0x1e   : > { %p646_p7 = pneg %p645_p6  ;;  %p650_p13 = por %p649_p10, %p648_p4 }
  0x20   : > { %p652_p1 = por %p651_p12, %p650_p13 }
  0x22   : > { %p653_p2 = pnand %p652_p1, %p646_p7 }
  0x24   : > { %656 = shalt.err (!%p653_p2)
}
  0x25   : > { %s657_s4 = scalar_lea.vmem %s892_s8, 32  ;;  %s790_s5 = smov [#allocation7]  }
  0x26   : > { %p658_p3 = scmp.ne.s32.totalorder %s892_s8, %s657_s4  ;;  %s662_s7 = sshll.u32 %s790_s5, 4  ;;  %s663_s7 = int_to_ptr.vmem [resolvable:$false] %s662_s7 }
  0x27   : > { %s664_s18 = scalar_lea.vmem %s663_s7, 64  ;;  %p665_p9 = scmp.lt.s32.totalorder %s892_s8, %s663_s7 }
  0x28   : > { %p660_p6 = pnand %p658_p3, %p644_p5  ;;  %p666_p4 = scmp.lt.s32.totalorder %s664_s18, %s657_s4 }
  0x2a   : > { %p661_p11 = pneg %p660_p6  ;;  %p667_p10 = por %p666_p4, %p665_p9 }
  0x2c   : > { %p668_p12 = pnand %p667_p10, %p661_p11 }
  0x2e   : > { %671 = shalt.err (!%p668_p12)
}
  0x2f   : > { %575 = dma.hbm_to_vmem [thread:$0]  (!%p896_p0), %s888_s6, 32, %s892_s8, %s178_s10  }
  0x30   : > { %p1051_p1 = scmp.lt.s32.totalorder %s788_s17, 3  ;;  %p1052_p2 = scmp.ge.s32.totalorder %s788_s17, 1 }
  0x31   : > { %s941_s22 = scalar_lea.hbm %s1041_s1, %s564_s30  ;;  %s203_s23 = scalar_lea.vmem [#allocation10], %s549_s29 }
  0x32   : > { %p932_p7 = pnand %p1052_p2, %p1051_p1  ;;  %s214_s4 = sshll.u32 %s203_s23, 4  ;;  %s215_s4 = int_to_ptr.vmem [resolvable:$true] %s214_s4 }
  0x33   : > { %s200_s6 = scalar_lea.sflag [#allocation11], %s879_s28  ;;  %s672_s8 = scalar_lea.hbm %s941_s22, 32 }
  0x34   : > { %s1053_s11 = scalar_select %p932_p7, 1, 0 }
  0x35   : > { %p673_p9 = scmp.ne.s32.totalorder %s941_s22, %s672_s8  ;;  %s677_s30 = scalar_lea.hbm %s1041_s1, 64 }
  0x36   : > { %p678_p3 = scmp.lt.u32.totalorder %s941_s22, %s1041_s1  ;;  %p679_p6 = scmp.lt.u32.totalorder %s677_s30, %s672_s8 }
  0x37   : > { %p675_p11 = pnand %p673_p9, %p644_p5  ;;  %p681_p10 = scmp.lt.u32.totalorder %s672_s8, %s941_s22 }
  0x38   : > { %p680_p4 = por %p679_p6, %p678_p3 }
  0x39   : > { %p676_p13 = pneg %p675_p11 }
  0x3a   : > { %p682_p12 = por %p681_p10, %p680_p4 }
  0x3c   : > { %p683_p1 = pnand %p682_p12, %p676_p13 }
  0x3e   : > { %686 = shalt.err (!%p683_p1)
}
  0x3f   : > { %s687_s28 = scalar_lea.vmem %s215_s4, 32  ;;  %s791_s29 = smov [#allocation10]  }
  0x40   : > { %p688_p2 = scmp.ne.s32.totalorder %s215_s4, %s687_s28  ;;  %s692_s19 = sshll.u32 %s791_s29, 4  ;;  %s693_s19 = int_to_ptr.vmem [resolvable:$false] %s692_s19 }
  0x41   : > { %s694_s21 = scalar_lea.vmem %s693_s19, 64  ;;  %p695_p8 = scmp.lt.s32.totalorder %s215_s4, %s693_s19 }
  0x42   : > { %p690_p9 = pnand %p688_p2, %p644_p5  ;;  %p696_p7 = scmp.lt.s32.totalorder %s694_s21, %s687_s28 }
  0x44   : > { %p691_p11 = pneg %p690_p9  ;;  %p697_p3 = por %p696_p7, %p695_p8 }
  0x46   : > { %p698_p6 = pnand %p697_p3, %p691_p11 }
  0x48   : > { %701 = shalt.err (!%p698_p6)
}
  0x49   : > { %578 = dma.hbm_to_vmem [thread:$0]  (!%p896_p0), %s941_s22, 32, %s215_s4, %s200_s6  }
  0x4a   : > { %p1054_p13 = scmp.ne.s32.totalorder %s1053_s11, 0 }
  0x4b   : > { %s968_s23 = sand.u32 (!%p1054_p13), 1, %s772_s13   ;;  %p1055_p5 = scmp.ne.s32.totalorder (!%p1054_p13), %s1047_s24, 0 }
  0x4c   : > { %236 = sbr.rel (%p1054_p13) target bundleno = 297 (0x129), region = 32  ;;  %s556_s8 = sshll.u32 (!%p1054_p13), %s968_s23, 1 }
  0x4d   : > { %s239_s10 = scalar_lea.sflag (!%p1054_p13), [#allocation8], %s968_s23  ;;  %s242_s5 = scalar_lea.vmem (!%p1054_p13), [#allocation7], %s556_s8 }
  0x53   : > { %755 = dma.done.wait (%p1055_p5), %s239_s10, 32  }
  0x54   : > { %757 = vsyncadd (%p1055_p5), %s239_s10, 4294967264  ;;  %s248_s9 = scalar_lea.sflag [#allocation11], %s968_s23  ;;  %s251_s22 = scalar_lea.vmem [#allocation10], %s556_s8 }
  0x55   : > { %759 = dma.done.wait (%p1055_p5), %s248_s9, 32  }
  0x56   : > { %761 = vsyncadd (%p1055_p5), %s248_s9, 4294967264  ;;  %p290_p8 = scmp.lt.s32.totalorder %s780_s15, 1  ;;  %v792_v0 = vmov 0.0   ;;  %v309_v1 = vld [vmem:[%s242_s5] sm:$0x3]  ;;  %vm366_vm0 = vcmask 1040384   ;;  %v363_v44 = vlaneseq }
  0x57   : > { %303 = vst [vmem:[#allocation2] sm:$0x1] %v792_v0  ;;  %304 = vst [vmem:[#allocation3] sm:$0x1] %v792_v0  ;;  %v331_v2 = vld [vmem:[%s251_s22] sm:$0x3] }
  0x58   : > { %305 = vst [vmem:[#allocation4] sm:$0x1] %v792_v0  ;;  %306 = vst [vmem:[#allocation5] sm:$0x1] %v792_v0  ;;  %s291_s11 = scalar_select %p290_p8, %s780_s15, 1  ;;  %v364_v45 = vand.u32 127, %v363_v44 }
  0x59   : > { %307 = vst [vmem:[#allocation6] sm:$0x1] %v792_v0  ;;  %v559_v3 = vmul.f32 -1.442695, %v309_v1  ;;  %v560_v5 = vmul.f32 -1.442695, %v331_v2 }
  0x5a   : > { %s558_s4 = sshll.u32 %s291_s11, 1  ;;  %vm371_vm1 = vcmp.eq.s32.totalorder %v364_v45, 0  ;;  %vm378_vm2 = vcmp.eq.s32.totalorder %v364_v45, 1  ;;  %vm385_vm3 = vcmp.eq.s32.totalorder %v364_v45, 2  ;;  %vm392_vm4 = vcmp.eq.s32.totalorder %v364_v45, 3  ;;  %s561_s24 = sshll.u32 %s780_s15, 4 }
  0x5b   : > { %s297_s7 = scalar_lea.vmem %s1042_s2, %s558_s4  ;;  %634 = vpow2.f32 %v559_v3  ;;  %s286_s18 = scalar_lea.vmem [#allocation12], %s968_s23  ;;  %vm399_vm5 = vcmp.eq.s32.totalorder %v364_v45, 4 }
  0x5c   : > { %v308_v4 = vld [vmem:[%s297_s7] sm:$0x3]  ;;  %636 = vpow2.f32 %v560_v5  ;;  %s417_s28 = sshll.u32 %s286_s18, 4  ;;  %s991_s21 = scalar_lea.hbm %s1043_s3, %s561_s24  ;;  %s993_s28 = int_to_ptr.vmem [resolvable:$true] %s417_s28 }
  0x5d   : > { %v355_v6 = vrot.slane %v308_v4, 1  ;;  %s403_s8 = scalar_lea.sflag [#allocation9], %s968_s23  ;;  %s702_s15 = scalar_lea.vmem %s993_s28, 16 }
  0x5e   : > { %v316_v24 = vld [vmem:[#allocation2] sm:$0x1]  ;;  %v338_v29 = vld [vmem:[#allocation3] sm:$0x1]  ;;  %p703_p0 = scmp.ne.s32.totalorder %s993_s28, %s702_s15  ;;  %p1056_p7 = scmp.ne.s32.totalorder %s1048_s25, 0 }
  0x5f   : > { %v357_v8 = vadd.f32 %v355_v6, %v308_v4  ;;  %v324_v18 = vld [vmem:[#allocation4] sm:$0x1]  ;;  %v346_v23 = vld [vmem:[#allocation5] sm:$0x1]  ;;  %s793_s10 = smov [#allocation12]  }
  0x60   : > { %v353_v7 = vld [vmem:[#allocation6] sm:$0x1]  ;;  %p704_p4 = pnand %p703_p0, %p1056_p7  ;;  %s706_s5 = sshll.u32 %s793_s10, 4  ;;  %s707_s5 = int_to_ptr.vmem [resolvable:$false] %s706_s5 }
  0x61   : > { %v358_v9 = vadd.f32 %v357_v8, %v353_v7  ;;  %s708_s9 = scalar_lea.vmem %s707_s5, 32  ;;  %p709_p12 = scmp.lt.s32.totalorder %s993_s28, %s707_s5 }
  0x62   : > { %p705_p10 = pneg %p704_p4  ;;  %p710_p1 = scmp.lt.s32.totalorder %s708_s9, %s702_s15 }
  0x63   : > { %359 = vst [vmem:[#allocation6] sm:$0x1] %v358_v9 }
  0x64   : > { %p711_p2 = por %p710_p1, %p709_p12 }
  0x65   : > { %v635_v10 = vpop.eup %634 }
  0x66   : > { %v637_v11 = vpop.eup %636  ;;  %v313_v12 = vadd.f32 1.0, %v635_v10  ;;  %p712_p9 = pnand %p711_p2, %p705_p10 }
  0x67   : > { %v335_v13 = vadd.f32 1.0, %v637_v11 }
  0x68   : > { %638 = vrcp.f32 %v313_v12 }
  0x69   : > { %640 = vrcp.f32 %v335_v13 }
  0x6a   : > { %v394_v42 = vld [vmem:[#allocation6] sm:$0x1] }
  0x6b   : > { %v395_v43 = vsel %vm366_vm0, %v394_v42, 0.0 }
  0x72   : > { %v639_v14 = vpop.eup %638 }
  0x73   : > { %v641_v15 = vpop.eup %640  ;;  %v317_v16 = vmul.f32 %v639_v14, %v308_v4  ;;  %v326_v17 = vrot.slane %v639_v14, 1 }
  0x74   : > { %v339_v19 = vmul.f32 %v641_v15, %v308_v4  ;;  %v348_v20 = vrot.slane %v641_v15, 1 }
  0x75   : > { %v319_v21 = vrot.slane %v317_v16, 1  ;;  %v328_v22 = vadd.f32 %v639_v14, %v326_v17 }
  0x76   : > { %v341_v25 = vrot.slane %v339_v19, 1  ;;  %v350_v26 = vadd.f32 %v641_v15, %v348_v20 }
  0x77   : > { %v321_v27 = vadd.f32 %v319_v21, %v317_v16  ;;  %v329_v28 = vadd.f32 %v328_v22, %v324_v18 }
  0x78   : > { %v343_v30 = vadd.f32 %v341_v25, %v339_v19  ;;  %v351_v31 = vadd.f32 %v350_v26, %v346_v23 }
  0x79   : > { %v322_v32 = vadd.f32 %v321_v27, %v316_v24  ;;  %330 = vst [vmem:[#allocation4] sm:$0x1] %v329_v28 }
  0x7a   : > { %v344_v33 = vadd.f32 %v343_v30, %v338_v29  ;;  %352 = vst [vmem:[#allocation5] sm:$0x1] %v351_v31 }
  0x7b   : > { %323 = vst [vmem:[#allocation2] sm:$0x1] %v322_v32 }
  0x7c   : > { %345 = vst [vmem:[#allocation3] sm:$0x1] %v344_v33 }
  0x80   : > { %v380_v34 = vld [vmem:[#allocation4] sm:$0x1] }
  0x81   : > { %v381_v35 = vsel %vm366_vm0, %v380_v34, 0.0  ;;  %v387_v36 = vld [vmem:[#allocation5] sm:$0x1] }
  0x82   : > { %v365_v37 = vld [vmem:[#allocation2] sm:$0x1]  ;;  %382 = vadd.xlane.f32.xlu1 %v381_v35  ;;  %v388_v40 = vsel %vm366_vm0, %v387_v36, 0.0 }
  0x83   : > { %v367_v38 = vsel %vm366_vm0, %v365_v37, 0.0  ;;  %v373_v39 = vld [vmem:[#allocation3] sm:$0x1] }
  0x84   : > { %368 = vadd.xlane.f32.xlu0 %v367_v38  ;;  %v374_v41 = vsel %vm366_vm0, %v373_v39, 0.0 }
  0x86   : > { %389 = vadd.xlane.f32.xlu1 %v388_v40 }
  0x88   : > { %375 = vadd.xlane.f32.xlu0 %v374_v41 }
  0x8c   : > { %396 = vadd.xlane.f32.xlu0 %v395_v43 }
 0x10f   : > { %v383_v46 = vpop.xlane.xlu1 %382 }
 0x111   : > { %v369_v47 = vpop.xlane.xlu0 %368 }
 0x112   : > { %v372_v48 = vsel %vm371_vm1, %v369_v47, 0.0 }
 0x113   : > { %v390_v50 = vpop.xlane.xlu1 %389 }
 0x115   : > { %v376_v49 = vpop.xlane.xlu0 %375 }
 0x116   : > { %v379_v51 = vsel %vm378_vm2, %v376_v49, %v372_v48 }
 0x117   : > { %v386_v52 = vsel %vm385_vm3, %v383_v46, %v379_v51 }
 0x118   : > { %v393_v53 = vsel %vm392_vm4, %v390_v50, %v386_v52 }
 0x119   : > { %v397_v54 = vpop.xlane.xlu0 %396 }
 0x11a   : > { %v400_v55 = vsel %vm399_vm5, %v397_v54, %v393_v53 }
 0x11b   : > { %401 = vst [vmem:[%s286_s18] sm:$0x1] %v400_v55 }
 0x11c   : > { %715 = shalt.err (!%p712_p9)
}
 0x11d   : > { %s716_s23 = scalar_lea.hbm %s991_s21, 16  ;;  %s720_s4 = scalar_lea.hbm %s1043_s3, 32 }
 0x11e   : > { %p717_p11 = scmp.ne.s32.totalorder %s991_s21, %s716_s23  ;;  %p721_p13 = scmp.lt.u32.totalorder %s991_s21, %s1043_s3 }
 0x11f   : > { %p722_p5 = scmp.lt.u32.totalorder %s720_s4, %s716_s23  ;;  %p724_p0 = scmp.lt.u32.totalorder %s716_s23, %s991_s21 }
 0x120   : > { %p718_p3 = pnand %p717_p11, %p1056_p7 }
 0x121   : > { %p723_p8 = por %p722_p5, %p721_p13 }
 0x122   : > { %p719_p6 = pneg %p718_p3 }
 0x123   : > { %p725_p4 = por %p724_p0, %p723_p8 }
 0x125   : > { %p726_p10 = pnand %p725_p4, %p719_p6 }
 0x127   : > { %729 = shalt.err (!%p726_p10)
}
 0x128   : > { %570 = dma.vmem_to_hbm [thread:$0]  (%p1056_p7), %s993_s28, 16, %s991_s21, %s403_s8  }
 0x129 PF: > { %s429_s7 = sand.u32 1, %s768_s12   ;;  %p1057_p12 = scmp.ne.s32.totalorder %s1049_s27, 0 }
 0x12a   : > { %p1058_p1 = scmp.ge.s32.totalorder %s788_s17, 2  ;;  %s430_s24 = scalar_lea.sflag [#allocation9], %s429_s7 }
 0x12c   : > { %p580_p2 = pnand %p1058_p1, %p1057_p12 }
 0x12e   : > { %763 = dma.done.wait (!%p580_p2), %s430_s24, 16  }
 0x12f   : > { %765 = vsyncadd (!%p580_p2), %s430_s24, 4294967280  ;;  %s22_s17 = sadd.s32 1, %s788_s17   ;;  %s1059_s12 = smov %s772_s13 }
 0x130   : > { %p19_p9 = scmp.ge.s32.totalorder %s22_s17, 4   ;;  %s1060_s13 = smov %s776_s14 }
 0x131   : > { %s1061_s14 = smov %s870_s26  ;;  %s1062_s15 = smov %s784_s16 }
 0x132   : > { %s1063_s16 = smov %s1065_s20  ;;  %21 = sbr.rel (!%p19_p9) target bundleno = 8 (0x8), region = 101 }
 0x139   :  { %434 = vsyncpa [#allocation8], 1 }
 0x13a   :  { %436 = vsyncpa [#allocation8 + $0x1], 1 }
 0x13b   :  { %437 = vsyncpa [#allocation11], 1 }
 0x13c   :  { %439 = vsyncpa [#allocation11 + $0x1], 1 }
 0x13d   :  { %440 = vsyncpa [#allocation9], 1 }
 0x13e   :  { %442 = vsyncpa [#allocation9 + $0x1], 1 }

</bundles_post_ra>
